<compile_context>
chip_gen: v7x
topology: tpu7x:2x2x1
jax: 0.10.0
libtpu: 0.0.40
codegen_flags: <defaults>
</compile_context>

<pallas_src>
import functools

import jax
import jax.numpy as jnp
from jax.experimental import pallas as pl
from jax.experimental.pallas import tpu as pltpu


# ----------------------------- kernels --------------------------------------


def _conv_bn_silu_kernel(w_ref, b_ref, x_ref, o_ref):
    # w_ref: (Cout, Cin) BN-folded weight; b_ref: (Cout, 1) BN-folded bias
    # x_ref: (Cin, T) spatial tile on lanes; o_ref: (Cout, T)
    acc = jnp.dot(w_ref[...], x_ref[...], preferred_element_type=jnp.float32)
    acc = acc + b_ref[...]
    o_ref[...] = (acc * (1.0 / (1.0 + jnp.exp(-acc)))).astype(o_ref.dtype)


def _conv4_bn_silu_kernel(wa_ref, wb_ref, wc_ref, wd_ref, b_ref,
                          xa_ref, xb_ref, xc_ref, xd_ref, o_ref):
    # cv2 over the virtual concat([x, y1, y2, y3], channel): 4 accumulated matmuls.
    acc = jnp.dot(wa_ref[...], xa_ref[...], preferred_element_type=jnp.float32)
    acc = acc + jnp.dot(wb_ref[...], xb_ref[...], preferred_element_type=jnp.float32)
    acc = acc + jnp.dot(wc_ref[...], xc_ref[...], preferred_element_type=jnp.float32)
    acc = acc + jnp.dot(wd_ref[...], xd_ref[...], preferred_element_type=jnp.float32)
    acc = acc + b_ref[...]
    o_ref[...] = (acc * (1.0 / (1.0 + jnp.exp(-acc)))).astype(o_ref.dtype)


def _make_pool_chain_kernel(k):
    r = k // 2

    def _pool2d(x):
        # x: (C, H, W); k x k max pool, stride 1, pad r (-inf edges), separable:
        # 1-D window max along W (lanes) then along H (sublanes).
        c, h, w = x.shape
        negw = jnp.full((c, h, r), -jnp.inf, x.dtype)
        xp = jnp.concatenate([negw, x, negw], axis=2)        # (c, h, w + 2r)
        m = xp[:, :, 0:w]
        for d in range(1, k):                                # static unroll, k small
            m = jnp.maximum(m, xp[:, :, d:d + w])
        negh = jnp.full((c, r, w), -jnp.inf, x.dtype)
        mp = jnp.concatenate([negh, m, negh], axis=1)        # (c, h + 2r, w)
        out = mp[:, 0:h, :]
        for d in range(1, k):
            out = jnp.maximum(out, mp[:, d:d + h, :])
        return out

    def kernel(x_ref, y1_ref, y2_ref, y3_ref):
        x = x_ref[...]
        y1 = _pool2d(x)
        y2 = _pool2d(y1)
        y3 = _pool2d(y2)
        y1_ref[...] = y1
        y2_ref[...] = y2
        y3_ref[...] = y3

    return kernel


# ----------------------------- wrappers --------------------------------------


def _spatial_tile(hw):
    # Lane-dense spatial tile: whole extent if small, else 512 lanes (mult. of 128).
    return hw if hw <= 512 else 512


def _channel_tile(c, h, w, itemsize):
    # Bound VMEM for the pool kernel: (1 in + 3 out) double-buffered + temps (~12x).
    budget = 8 * 1024 * 1024
    per_chan = h * w * itemsize * 12
    return max(1, min(c, budget // max(per_chan, 1)))


def conv1x1_bn_silu(x_flat, w, b):
    # x_flat: (B, Cin, HW); w: (Cout, Cin); b: (Cout,)
    bsz, cin, hw = x_flat.shape
    cout = w.shape[0]
    t = _spatial_tile(hw)
    itemsize = jnp.dtype(x_flat.dtype).itemsize
    return pl.pallas_call(
        _conv_bn_silu_kernel,
        out_shape=jax.ShapeDtypeStruct((bsz, cout, hw), x_flat.dtype),
        grid=(bsz, pl.cdiv(hw, t)),
        in_specs=[
            pl.BlockSpec((cout, cin), lambda bi, ti: (0, 0)),
            pl.BlockSpec((cout, 1), lambda bi, ti: (0, 0)),
            pl.BlockSpec((None, cin, t), lambda bi, ti: (bi, 0, ti)),
        ],
        out_specs=pl.BlockSpec((None, cout, t), lambda bi, ti: (bi, 0, ti)),
        compiler_params=pltpu.CompilerParams(
            dimension_semantics=("parallel", "parallel")),
        cost_estimate=pl.CostEstimate(
            flops=2 * bsz * cout * cin * hw,
            transcendentals=bsz * cout * hw,
            bytes_accessed=(bsz * cin * hw + bsz * cout * hw
                            + cout * cin + cout) * itemsize),
    )(w, b.reshape(cout, 1), x_flat)


def conv1x1x4_bn_silu(x0, x1, x2, x3, w, b):
    # x*: (B, c_, HW); w: (Cout, 4*c_); b: (Cout,)
    bsz, c_, hw = x0.shape
    cout = w.shape[0]
    t = _spatial_tile(hw)
    itemsize = jnp.dtype(x0.dtype).itemsize
    w_parts = [w[:, i * c_:(i + 1) * c_] for i in range(4)]
    w_spec = pl.BlockSpec((cout, c_), lambda bi, ti: (0, 0))
    a_spec = pl.BlockSpec((None, c_, t), lambda bi, ti: (bi, 0, ti))
    return pl.pallas_call(
        _conv4_bn_silu_kernel,
        out_shape=jax.ShapeDtypeStruct((bsz, cout, hw), x0.dtype),
        grid=(bsz, pl.cdiv(hw, t)),
        in_specs=[w_spec, w_spec, w_spec, w_spec,
                  pl.BlockSpec((cout, 1), lambda bi, ti: (0, 0)),
                  a_spec, a_spec, a_spec, a_spec],
        out_specs=pl.BlockSpec((None, cout, t), lambda bi, ti: (bi, 0, ti)),
        compiler_params=pltpu.CompilerParams(
            dimension_semantics=("parallel", "parallel")),
        cost_estimate=pl.CostEstimate(
            flops=2 * bsz * cout * 4 * c_ * hw,
            transcendentals=bsz * cout * hw,
            bytes_accessed=(4 * bsz * c_ * hw + bsz * cout * hw
                            + cout * 4 * c_ + cout) * itemsize),
    )(*w_parts, b.reshape(cout, 1), x0, x1, x2, x3)


def maxpool_chain(x, k=5):
    # x: (B, C, H, W) -> (y1, y2, y3), three chained k x k / s1 / pad k//2 max pools.
    bsz, c, h, w = x.shape
    itemsize = jnp.dtype(x.dtype).itemsize
    ct = _channel_tile(c, h, w, itemsize)
    spec = pl.BlockSpec((None, ct, h, w), lambda bi, ci: (bi, ci, 0, 0))
    y_shape = jax.ShapeDtypeStruct((bsz, c, h, w), x.dtype)
    return pl.pallas_call(
        _make_pool_chain_kernel(k),
        out_shape=(y_shape, y_shape, y_shape),
        grid=(bsz, pl.cdiv(c, ct)),
        in_specs=[spec],
        out_specs=(spec, spec, spec),
        compiler_params=pltpu.CompilerParams(
            dimension_semantics=("parallel", "parallel")),
        cost_estimate=pl.CostEstimate(
            flops=3 * 2 * (k - 1) * bsz * c * h * w,
            transcendentals=0,
            bytes_accessed=4 * bsz * c * h * w * itemsize),
    )(x)


def fold_bn(w, gamma, beta, mean, var, eps=1e-5):
    # Fold eval-mode BatchNorm2d into the bias-free 1x1 conv.
    scale = gamma / jnp.sqrt(var + eps)
    return w * scale[:, None], beta - mean * scale


@functools.partial(jax.jit, static_argnames=("k",))
def sppf(x, w1, b1, w2, b2, k=5):
    # x: (B, c1, H, W) NCHW; w1: (c_, c1); w2: (c2, 4*c_); b1/b2: BN-folded biases.
    bsz, c1, h, w = x.shape
    c_ = w1.shape[0]
    c2 = w2.shape[0]
    hw = h * w
    x_flat = x.reshape(bsz, c1, hw)                       # free view
    xc_flat = conv1x1_bn_silu(x_flat, w1, b1)             # cv1
    xc = xc_flat.reshape(bsz, c_, h, w)
    y1, y2, y3 = maxpool_chain(xc, k)                     # chained max pools
    out_flat = conv1x1x4_bn_silu(                         # cv2 (concat never built)
        xc_flat,
        y1.reshape(bsz, c_, hw),
        y2.reshape(bsz, c_, hw),
        y3.reshape(bsz, c_, hw),
        w2, b2)
    return out_flat.reshape(bsz, c2, h, w)


# ----------------------------- reference --------------------------------------


def sppf_reference(x, w1, b1, w2, b2, k=5):
    def conv_bn_silu(v, wt, bias):
        y = jnp.einsum("oc,bchw->bohw", wt, v,
                       precision=jax.lax.Precision.HIGHEST)
        y = y + bias[None, :, None, None]
        return y * jax.nn.sigmoid(y)

    def maxpool(v):
        r = k // 2
        return jax.lax.reduce_window(
            v, -jnp.inf, jax.lax.max,
            window_dimensions=(1, 1, k, k),
            window_strides=(1, 1, 1, 1),
            padding=((0, 0), (0, 0), (r, r), (r, r)))

    xc = conv_bn_silu(x, w1, b1)
    y1 = maxpool(xc)
    y2 = maxpool(y1)
    y3 = maxpool(y2)
    cat = jnp.concatenate([xc, y1, y2, y3], axis=1)
    return conv_bn_silu(cat, w2, b2)


# TODO(synk): training-mode BatchNorm (batch statistics) is not implemented; this is
# the standard fused-inference (eval-mode) form of Conv = conv + BN + SiLU.

if __name__ == "__main__":
    key = jax.random.PRNGKey(0)
    bsz, c1, h, w = 2, 4, 16, 16
    c2 = 8
    k = 5
    c_ = c1 // 2

    ks = jax.random.split(key, 11)
    x = jax.random.normal(ks[0], (bsz, c1, h, w), dtype=jnp.float32)

    w1 = 0.5 * jax.random.normal(ks[1], (c_, c1), jnp.float32)
    g1 = jax.random.uniform(ks[2], (c_,), jnp.float32, 0.5, 1.5)
    beta1 = 0.1 * jax.random.normal(ks[3], (c_,), jnp.float32)
    mu1 = 0.1 * jax.random.normal(ks[4], (c_,), jnp.float32)
    var1 = jax.random.uniform(ks[5], (c_,), jnp.float32, 0.5, 1.5)

    w2 = 0.5 * jax.random.normal(ks[6], (c2, 4 * c_), jnp.float32)
    g2 = jax.random.uniform(ks[7], (c2,), jnp.float32, 0.5, 1.5)
    beta2 = 0.1 * jax.random.normal(ks[8], (c2,), jnp.float32)
    mu2 = 0.1 * jax.random.normal(ks[9], (c2,), jnp.float32)
    var2 = jax.random.uniform(ks[10], (c2,), jnp.float32, 0.5, 1.5)

    w1f, b1f = fold_bn(w1, g1, beta1, mu1, var1)
    w2f, b2f = fold_bn(w2, g2, beta2, mu2, var2)

    out = sppf(x, w1f, b1f, w2f, b2f, k=k)
    out = jax.block_until_ready(out)

    ref = sppf_reference(x, w1f, b1f, w2f, b2f, k=k)
    assert out.shape == (bsz, c2, h, w), out.shape
    assert out.dtype == x.dtype
    assert jnp.allclose(out, ref, atol=1e-4, rtol=1e-4), (
        "max abs diff = %g" % float(jnp.max(jnp.abs(out - ref))))
    print("KERNEL_OK")
</pallas_src>

<mosaic_0001>
module attributes {stable_mosaic.version = 11 : i64} {
  func.func @_conv_bn_silu_kernel(%arg0: i32, %arg1: i32, %arg2: memref<2x4xf32, #tpu.memory_space<vmem>>, %arg3: memref<2x1xf32, #tpu.memory_space<vmem>>, %arg4: memref<1x4x256xf32, #tpu.memory_space<vmem>>, %arg5: memref<1x2x256xf32, #tpu.memory_space<vmem>>) attributes {dimension_semantics = [#tpu.dimension_semantics<parallel>, #tpu.dimension_semantics<parallel>], iteration_bounds = array<i64: 2, 1>, scalar_prefetch = 0 : i64, scratch_operands = 0 : i64, tpu.core_type = #tpu.core_type<tc>, window_params = [{pipeline_mode = #tpu.pipeline_mode<synchronous>, transform_indices = @transform_0, window_bounds = array<i64: 2, 4>}, {pipeline_mode = #tpu.pipeline_mode<synchronous>, transform_indices = @transform_1, window_bounds = array<i64: 2, 1>}, {transform_indices = @transform_2, window_bounds = array<i64: 1, 4, 256>}, {transform_indices = @transform_3, window_bounds = array<i64: 1, 2, 256>}]} {
    %c0 = arith.constant 0 : index
    %c0_0 = arith.constant 0 : index
    %0 = vector.load %arg2[%c0, %c0_0] : memref<2x4xf32, #tpu.memory_space<vmem>>, vector<2x4xf32>
    %c0_1 = arith.constant 0 : index
    %c0_2 = arith.constant 0 : index
    %c0_3 = arith.constant 0 : index
    %1 = vector.load %arg4[%c0_1, %c0_2, %c0_3] : memref<1x4x256xf32, #tpu.memory_space<vmem>>, vector<1x4x256xf32>
    %2 = vector.shape_cast %1 : vector<1x4x256xf32> to vector<4x256xf32>
    %cst = arith.constant dense<0.000000e+00> : vector<2x256xf32>
    %3 = tpu.matmul %0, %2, %cst {dimension_numbers = #tpu.dot_dimension_numbers<[1], [0], [0], [1], [0, 0, 1, 1], [], []>} : vector<2x4xf32>, vector<4x256xf32>, vector<2x256xf32> -> vector<2x256xf32>
    %c0_4 = arith.constant 0 : index
    %c0_5 = arith.constant 0 : index
    %4 = vector.load %arg3[%c0_4, %c0_5] : memref<2x1xf32, #tpu.memory_space<vmem>>, vector<2x1xf32>
    %5 = vector.broadcast %4 : vector<2x1xf32> to vector<2x256xf32>
    %6 = arith.addf %3, %5 : vector<2x256xf32>
    %cst_6 = arith.constant 0.000000e+00 : f32
    %7 = vector.broadcast %cst_6 : f32 to vector<2x256xf32>
    %8 = arith.subf %7, %6 : vector<2x256xf32>
    %9 = math.exp %8 : vector<2x256xf32>
    %cst_7 = arith.constant 1.000000e+00 : f32
    %10 = vector.broadcast %cst_7 : f32 to vector<2x256xf32>
    %11 = arith.addf %10, %9 : vector<2x256xf32>
    %cst_8 = arith.constant 1.000000e+00 : f32
    %12 = vector.broadcast %cst_8 : f32 to vector<2x256xf32>
    %13 = arith.divf %12, %11 : vector<2x256xf32>
    %14 = arith.mulf %6, %13 : vector<2x256xf32>
    %c0_9 = arith.constant 0 : index
    %c0_10 = arith.constant 0 : index
    %c0_11 = arith.constant 0 : index
    %15 = vector.load %arg5[%c0_9, %c0_10, %c0_11] : memref<1x2x256xf32, #tpu.memory_space<vmem>>, vector<1x2x256xf32>
    %16 = vector.shape_cast %15 : vector<1x2x256xf32> to vector<2x256xf32>
    %17 = vector.shape_cast %14 : vector<2x256xf32> to vector<1x2x256xf32>
    tpu.vector_store %arg5[%c0_9, %c0_10, %c0_11], %17 {strides = array<i32>} : memref<1x2x256xf32, #tpu.memory_space<vmem>>, vector<1x2x256xf32>,
    return
  }
  func.func @transform_0(%arg0: i32, %arg1: i32) -> (i32, i32) {
    %c0_i32 = arith.constant 0 : i32
    %c0_i32_0 = arith.constant 0 : i32
    %c0_i32_1 = arith.constant 0 : i32
    return %c0_i32, %c0_i32_0 : i32, i32
  }
  func.func @transform_1(%arg0: i32, %arg1: i32) -> (i32, i32) {
    %c0_i32 = arith.constant 0 : i32
    %c0_i32_0 = arith.constant 0 : i32
    %c0_i32_1 = arith.constant 0 : i32
    return %c0_i32, %c0_i32_0 : i32, i32
  }
  func.func @transform_2(%arg0: i32, %arg1: i32) -> (i32, i32, i32) {
    %c0_i32 = arith.constant 0 : i32
    %c0_i32_0 = arith.constant 0 : i32
    return %arg0, %c0_i32, %arg1 : i32, i32, i32
  }
  func.func @transform_3(%arg0: i32, %arg1: i32) -> (i32, i32, i32) {
    %c0_i32 = arith.constant 0 : i32
    %c0_i32_0 = arith.constant 0 : i32
    return %arg0, %c0_i32, %arg1 : i32, i32, i32
  }
}

module attributes {stable_mosaic.version = 11 : i64} {
  func.func @kernel(%arg0: i32, %arg1: i32, %arg2: memref<1x2x16x16xf32, #tpu.memory_space<vmem>>, %arg3: memref<1x2x16x16xf32, #tpu.memory_space<vmem>>, %arg4: memref<1x2x16x16xf32, #tpu.memory_space<vmem>>, %arg5: memref<1x2x16x16xf32, #tpu.memory_space<vmem>>) attributes {dimension_semantics = [#tpu.dimension_semantics<parallel>, #tpu.dimension_semantics<parallel>], iteration_bounds = array<i64: 2, 1>, scalar_prefetch = 0 : i64, scratch_operands = 0 : i64, tpu.core_type = #tpu.core_type<tc>, window_params = [{transform_indices = @transform_0, window_bounds = array<i64: 1, 2, 16, 16>}, {transform_indices = @transform_1, window_bounds = array<i64: 1, 2, 16, 16>}, {transform_indices = @transform_2, window_bounds = array<i64: 1, 2, 16, 16>}, {transform_indices = @transform_3, window_bounds = array<i64: 1, 2, 16, 16>}]} {
    %c0 = arith.constant 0 : index
    %c0_0 = arith.constant 0 : index
    %c0_1 = arith.constant 0 : index
    %c0_2 = arith.constant 0 : index
    %0 = vector.load %arg2[%c0, %c0_0, %c0_1, %c0_2] : memref<1x2x16x16xf32, #tpu.memory_space<vmem>>, vector<1x2x16x16xf32>
    %1 = vector.shape_cast %0 : vector<1x2x16x16xf32> to vector<2x16x16xf32>
    %cst = arith.constant 0xFF800000 : f32
    %2 = vector.broadcast %cst : f32 to vector<2x16x2xf32>
    %3 = tpu.concatenate %2, %1, %2 in 2 : vector<2x16x2xf32>, vector<2x16x16xf32>, vector<2x16x2xf32> -> vector<2x16x20xf32>
    %4 = vector.extract_strided_slice %3 {offsets = [0, 0, 0], sizes = [2, 16, 16], strides = [1, 1, 1]} : vector<2x16x20xf32> to vector<2x16x16xf32>
    %5 = vector.extract_strided_slice %3 {offsets = [0, 0, 1], sizes = [2, 16, 16], strides = [1, 1, 1]} : vector<2x16x20xf32> to vector<2x16x16xf32>
    %6 = arith.maximumf %4, %5 : vector<2x16x16xf32>
    %7 = vector.extract_strided_slice %3 {offsets = [0, 0, 2], sizes = [2, 16, 16], strides = [1, 1, 1]} : vector<2x16x20xf32> to vector<2x16x16xf32>
    %8 = arith.maximumf %6, %7 : vector<2x16x16xf32>
    %9 = vector.extract_strided_slice %3 {offsets = [0, 0, 3], sizes = [2, 16, 16], strides = [1, 1, 1]} : vector<2x16x20xf32> to vector<2x16x16xf32>
    %10 = arith.maximumf %8, %9 : vector<2x16x16xf32>
    %11 = vector.extract_strided_slice %3 {offsets = [0, 0, 4], sizes = [2, 16, 16], strides = [1, 1, 1]} : vector<2x16x20xf32> to vector<2x16x16xf32>
    %12 = arith.maximumf %10, %11 : vector<2x16x16xf32>
    %cst_3 = arith.constant 0xFF800000 : f32
    %13 = vector.broadcast %cst_3 : f32 to vector<2x2x16xf32>
    %14 = tpu.concatenate %13, %12, %13 in 1 : vector<2x2x16xf32>, vector<2x16x16xf32>, vector<2x2x16xf32> -> vector<2x20x16xf32>
    %15 = vector.extract_strided_slice %14 {offsets = [0, 0, 0], sizes = [2, 16, 16], strides = [1, 1, 1]} : vector<2x20x16xf32> to vector<2x16x16xf32>
    %16 = vector.extract_strided_slice %14 {offsets = [0, 1, 0], sizes = [2, 16, 16], strides = [1, 1, 1]} : vector<2x20x16xf32> to vector<2x16x16xf32>
    %17 = arith.maximumf %15, %16 : vector<2x16x16xf32>
    %18 = vector.extract_strided_slice %14 {offsets = [0, 2, 0], sizes = [2, 16, 16], strides = [1, 1, 1]} : vector<2x20x16xf32> to vector<2x16x16xf32>
    %19 = arith.maximumf %17, %18 : vector<2x16x16xf32>
    %20 = vector.extract_strided_slice %14 {offsets = [0, 3, 0], sizes = [2, 16, 16], strides = [1, 1, 1]} : vector<2x20x16xf32> to vector<2x16x16xf32>
    %21 = arith.maximumf %19, %20 : vector<2x16x16xf32>
    %22 = vector.extract_strided_slice %14 {offsets = [0, 4, 0], sizes = [2, 16, 16], strides = [1, 1, 1]} : vector<2x20x16xf32> to vector<2x16x16xf32>
    %23 = arith.maximumf %21, %22 : vector<2x16x16xf32>
    %cst_4 = arith.constant 0xFF800000 : f32
    %24 = vector.broadcast %cst_4 : f32 to vector<2x16x2xf32>
    %25 = tpu.concatenate %24, %23, %24 in 2 : vector<2x16x2xf32>, vector<2x16x16xf32>, vector<2x16x2xf32> -> vector<2x16x20xf32>
    %26 = vector.extract_strided_slice %25 {offsets = [0, 0, 0], sizes = [2, 16, 16], strides = [1, 1, 1]} : vector<2x16x20xf32> to vector<2x16x16xf32>
    %27 = vector.extract_strided_slice %25 {offsets = [0, 0, 1], sizes = [2, 16, 16], strides = [1, 1, 1]} : vector<2x16x20xf32> to vector<2x16x16xf32>
    %28 = arith.maximumf %26, %27 : vector<2x16x16xf32>
    %29 = vector.extract_strided_slice %25 {offsets = [0, 0, 2], sizes = [2, 16, 16], strides = [1, 1, 1]} : vector<2x16x20xf32> to vector<2x16x16xf32>
    %30 = arith.maximumf %28, %29 : vector<2x16x16xf32>
    %31 = vector.extract_strided_slice %25 {offsets = [0, 0, 3], sizes = [2, 16, 16], strides = [1, 1, 1]} : vector<2x16x20xf32> to vector<2x16x16xf32>
    %32 = arith.maximumf %30, %31 : vector<2x16x16xf32>
    %33 = vector.extract_strided_slice %25 {offsets = [0, 0, 4], sizes = [2, 16, 16], strides = [1, 1, 1]} : vector<2x16x20xf32> to vector<2x16x16xf32>
    %34 = arith.maximumf %32, %33 : vector<2x16x16xf32>
    %cst_5 = arith.constant 0xFF800000 : f32
    %35 = vector.broadcast %cst_5 : f32 to vector<2x2x16xf32>
    %36 = tpu.concatenate %35, %34, %35 in 1 : vector<2x2x16xf32>, vector<2x16x16xf32>, vector<2x2x16xf32> -> vector<2x20x16xf32>
    %37 = vector.extract_strided_slice %36 {offsets = [0, 0, 0], sizes = [2, 16, 16], strides = [1, 1, 1]} : vector<2x20x16xf32> to vector<2x16x16xf32>
    %38 = vector.extract_strided_slice %36 {offsets = [0, 1, 0], sizes = [2, 16, 16], strides = [1, 1, 1]} : vector<2x20x16xf32> to vector<2x16x16xf32>
    %39 = arith.maximumf %37, %38 : vector<2x16x16xf32>
    %40 = vector.extract_strided_slice %36 {offsets = [0, 2, 0], sizes = [2, 16, 16], strides = [1, 1, 1]} : vector<2x20x16xf32> to vector<2x16x16xf32>
    %41 = arith.maximumf %39, %40 : vector<2x16x16xf32>
    %42 = vector.extract_strided_slice %36 {offsets = [0, 3, 0], sizes = [2, 16, 16], strides = [1, 1, 1]} : vector<2x20x16xf32> to vector<2x16x16xf32>
    %43 = arith.maximumf %41, %42 : vector<2x16x16xf32>
    %44 = vector.extract_strided_slice %36 {offsets = [0, 4, 0], sizes = [2, 16, 16], strides = [1, 1, 1]} : vector<2x20x16xf32> to vector<2x16x16xf32>
    %45 = arith.maximumf %43, %44 : vector<2x16x16xf32>
    %cst_6 = arith.constant 0xFF800000 : f32
    %46 = vector.broadcast %cst_6 : f32 to vector<2x16x2xf32>
    %47 = tpu.concatenate %46, %45, %46 in 2 : vector<2x16x2xf32>, vector<2x16x16xf32>, vector<2x16x2xf32> -> vector<2x16x20xf32>
    %48 = vector.extract_strided_slice %47 {offsets = [0, 0, 0], sizes = [2, 16, 16], strides = [1, 1, 1]} : vector<2x16x20xf32> to vector<2x16x16xf32>
    %49 = vector.extract_strided_slice %47 {offsets = [0, 0, 1], sizes = [2, 16, 16], strides = [1, 1, 1]} : vector<2x16x20xf32> to vector<2x16x16xf32>
    %50 = arith.maximumf %48, %49 : vector<2x16x16xf32>
    %51 = vector.extract_strided_slice %47 {offsets = [0, 0, 2], sizes = [2, 16, 16], strides = [1, 1, 1]} : vector<2x16x20xf32> to vector<2x16x16xf32>
    %52 = arith.maximumf %50, %51 : vector<2x16x16xf32>
    %53 = vector.extract_strided_slice %47 {offsets = [0, 0, 3], sizes = [2, 16, 16], strides = [1, 1, 1]} : vector<2x16x20xf32> to vector<2x16x16xf32>
    %54 = arith.maximumf %52, %53 : vector<2x16x16xf32>
    %55 = vector.extract_strided_slice %47 {offsets = [0, 0, 4], sizes = [2, 16, 16], strides = [1, 1, 1]} : vector<2x16x20xf32> to vector<2x16x16xf32>
    %56 = arith.maximumf %54, %55 : vector<2x16x16xf32>
    %cst_7 = arith.constant 0xFF800000 : f32
    %57 = vector.broadcast %cst_7 : f32 to vector<2x2x16xf32>
    %58 = tpu.concatenate %57, %56, %57 in 1 : vector<2x2x16xf32>, vector<2x16x16xf32>, vector<2x2x16xf32> -> vector<2x20x16xf32>
    %59 = vector.extract_strided_slice %58 {offsets = [0, 0, 0], sizes = [2, 16, 16], strides = [1, 1, 1]} : vector<2x20x16xf32> to vector<2x16x16xf32>
    %60 = vector.extract_strided_slice %58 {offsets = [0, 1, 0], sizes = [2, 16, 16], strides = [1, 1, 1]} : vector<2x20x16xf32> to vector<2x16x16xf32>
    %61 = arith.maximumf %59, %60 : vector<2x16x16xf32>
    %62 = vector.extract_strided_slice %58 {offsets = [0, 2, 0], sizes = [2, 16, 16], strides = [1, 1, 1]} : vector<2x20x16xf32> to vector<2x16x16xf32>
    %63 = arith.maximumf %61, %62 : vector<2x16x16xf32>
    %64 = vector.extract_strided_slice %58 {offsets = [0, 3, 0], sizes = [2, 16, 16], strides = [1, 1, 1]} : vector<2x20x16xf32> to vector<2x16x16xf32>
    %65 = arith.maximumf %63, %64 : vector<2x16x16xf32>
    %66 = vector.extract_strided_slice %58 {offsets = [0, 4, 0], sizes = [2, 16, 16], strides = [1, 1, 1]} : vector<2x20x16xf32> to vector<2x16x16xf32>
    %67 = arith.maximumf %65, %66 : vector<2x16x16xf32>
    %c0_8 = arith.constant 0 : index
    %c0_9 = arith.constant 0 : index
    %c0_10 = arith.constant 0 : index
    %c0_11 = arith.constant 0 : index
    %68 = vector.load %arg3[%c0_8, %c0_9, %c0_10, %c0_11] : memref<1x2x16x16xf32, #tpu.memory_space<vmem>>, vector<1x2x16x16xf32>
    %69 = vector.shape_cast %68 : vector<1x2x16x16xf32> to vector<2x16x16xf32>
    %70 = vector.shape_cast %23 : vector<2x16x16xf32> to vector<1x2x16x16xf32>
    tpu.vector_store %arg3[%c0_8, %c0_9, %c0_10, %c0_11], %70 {strides = array<i32>} : memref<1x2x16x16xf32, #tpu.memory_space<vmem>>, vector<1x2x16x16xf32>,
    %c0_12 = arith.constant 0 : index
    %c0_13 = arith.constant 0 : index
    %c0_14 = arith.constant 0 : index
    %c0_15 = arith.constant 0 : index
    %71 = vector.load %arg4[%c0_12, %c0_13, %c0_14, %c0_15] : memref<1x2x16x16xf32, #tpu.memory_space<vmem>>, vector<1x2x16x16xf32>
    %72 = vector.shape_cast %71 : vector<1x2x16x16xf32> to vector<2x16x16xf32>
    %73 = vector.shape_cast %45 : vector<2x16x16xf32> to vector<1x2x16x16xf32>
    tpu.vector_store %arg4[%c0_12, %c0_13, %c0_14, %c0_15], %73 {strides = array<i32>} : memref<1x2x16x16xf32, #tpu.memory_space<vmem>>, vector<1x2x16x16xf32>,
    %c0_16 = arith.constant 0 : index
    %c0_17 = arith.constant 0 : index
    %c0_18 = arith.constant 0 : index
    %c0_19 = arith.constant 0 : index
    %74 = vector.load %arg5[%c0_16, %c0_17, %c0_18, %c0_19] : memref<1x2x16x16xf32, #tpu.memory_space<vmem>>, vector<1x2x16x16xf32>
    %75 = vector.shape_cast %74 : vector<1x2x16x16xf32> to vector<2x16x16xf32>
    %76 = vector.shape_cast %67 : vector<2x16x16xf32> to vector<1x2x16x16xf32>
    tpu.vector_store %arg5[%c0_16, %c0_17, %c0_18, %c0_19], %76 {strides = array<i32>} : memref<1x2x16x16xf32, #tpu.memory_space<vmem>>, vector<1x2x16x16xf32>,
    return
  }
  func.func @transform_0(%arg0: i32, %arg1: i32) -> (i32, i32, i32, i32) {
    %c0_i32 = arith.constant 0 : i32
    %c0_i32_0 = arith.constant 0 : i32
    %c0_i32_1 = arith.constant 0 : i32
    return %arg0, %arg1, %c0_i32, %c0_i32_0 : i32, i32, i32, i32
  }
  func.func @transform_1(%arg0: i32, %arg1: i32) -> (i32, i32, i32, i32) {
    %c0_i32 = arith.constant 0 : i32
    %c0_i32_0 = arith.constant 0 : i32
    %c0_i32_1 = arith.constant 0 : i32
    return %arg0, %arg1, %c0_i32, %c0_i32_0 : i32, i32, i32, i32
  }
  func.func @transform_2(%arg0: i32, %arg1: i32) -> (i32, i32, i32, i32) {
    %c0_i32 = arith.constant 0 : i32
    %c0_i32_0 = arith.constant 0 : i32
    %c0_i32_1 = arith.constant 0 : i32
    return %arg0, %arg1, %c0_i32, %c0_i32_0 : i32, i32, i32, i32
  }
  func.func @transform_3(%arg0: i32, %arg1: i32) -> (i32, i32, i32, i32) {
    %c0_i32 = arith.constant 0 : i32
    %c0_i32_0 = arith.constant 0 : i32
    %c0_i32_1 = arith.constant 0 : i32
    return %arg0, %arg1, %c0_i32, %c0_i32_0 : i32, i32, i32, i32
  }
}

module attributes {stable_mosaic.version = 11 : i64} {
  func.func @_conv4_bn_silu_kernel(%arg0: i32, %arg1: i32, %arg2: memref<8x2xf32, #tpu.memory_space<vmem>>, %arg3: memref<8x2xf32, #tpu.memory_space<vmem>>, %arg4: memref<8x2xf32, #tpu.memory_space<vmem>>, %arg5: memref<8x2xf32, #tpu.memory_space<vmem>>, %arg6: memref<8x1xf32, #tpu.memory_space<vmem>>, %arg7: memref<1x2x256xf32, #tpu.memory_space<vmem>>, %arg8: memref<1x2x256xf32, #tpu.memory_space<vmem>>, %arg9: memref<1x2x256xf32, #tpu.memory_space<vmem>>, %arg10: memref<1x2x256xf32, #tpu.memory_space<vmem>>, %arg11: memref<1x8x256xf32, #tpu.memory_space<vmem>>) attributes {dimension_semantics = [#tpu.dimension_semantics<parallel>, #tpu.dimension_semantics<parallel>], iteration_bounds = array<i64: 2, 1>, scalar_prefetch = 0 : i64, scratch_operands = 0 : i64, tpu.core_type = #tpu.core_type<tc>, window_params = [{pipeline_mode = #tpu.pipeline_mode<synchronous>, transform_indices = @transform_0, window_bounds = array<i64: 8, 2>}, {pipeline_mode = #tpu.pipeline_mode<synchronous>, transform_indices = @transform_1, window_bounds = array<i64: 8, 2>}, {pipeline_mode = #tpu.pipeline_mode<synchronous>, transform_indices = @transform_2, window_bounds = array<i64: 8, 2>}, {pipeline_mode = #tpu.pipeline_mode<synchronous>, transform_indices = @transform_3, window_bounds = array<i64: 8, 2>}, {pipeline_mode = #tpu.pipeline_mode<synchronous>, transform_indices = @transform_4, window_bounds = array<i64: 8, 1>}, {transform_indices = @transform_5, window_bounds = array<i64: 1, 2, 256>}, {transform_indices = @transform_6, window_bounds = array<i64: 1, 2, 256>}, {transform_indices = @transform_7, window_bounds = array<i64: 1, 2, 256>}, {transform_indices = @transform_8, window_bounds = array<i64: 1, 2, 256>}, {transform_indices = @transform_9, window_bounds = array<i64: 1, 8, 256>}]} {
    %c0 = arith.constant 0 : index
    %c0_0 = arith.constant 0 : index
    %0 = vector.load %arg2[%c0, %c0_0] : memref<8x2xf32, #tpu.memory_space<vmem>>, vector<8x2xf32>
    %c0_1 = arith.constant 0 : index
    %c0_2 = arith.constant 0 : index
    %c0_3 = arith.constant 0 : index
    %1 = vector.load %arg7[%c0_1, %c0_2, %c0_3] : memref<1x2x256xf32, #tpu.memory_space<vmem>>, vector<1x2x256xf32>
    %2 = vector.shape_cast %1 : vector<1x2x256xf32> to vector<2x256xf32>
    %cst = arith.constant dense<0.000000e+00> : vector<8x256xf32>
    %3 = tpu.matmul %0, %2, %cst {dimension_numbers = #tpu.dot_dimension_numbers<[1], [0], [0], [1], [0, 0, 1, 1], [], []>} : vector<8x2xf32>, vector<2x256xf32>, vector<8x256xf32> -> vector<8x256xf32>
    %c0_4 = arith.constant 0 : index
    %c0_5 = arith.constant 0 : index
    %4 = vector.load %arg3[%c0_4, %c0_5] : memref<8x2xf32, #tpu.memory_space<vmem>>, vector<8x2xf32>
    %c0_6 = arith.constant 0 : index
    %c0_7 = arith.constant 0 : index
    %c0_8 = arith.constant 0 : index
    %5 = vector.load %arg8[%c0_6, %c0_7, %c0_8] : memref<1x2x256xf32, #tpu.memory_space<vmem>>, vector<1x2x256xf32>
    %6 = vector.shape_cast %5 : vector<1x2x256xf32> to vector<2x256xf32>
    %cst_9 = arith.constant dense<0.000000e+00> : vector<8x256xf32>
    %7 = tpu.matmul %4, %6, %cst_9 {dimension_numbers = #tpu.dot_dimension_numbers<[1], [0], [0], [1], [0, 0, 1, 1], [], []>} : vector<8x2xf32>, vector<2x256xf32>, vector<8x256xf32> -> vector<8x256xf32>
    %8 = arith.addf %3, %7 : vector<8x256xf32>
    %c0_10 = arith.constant 0 : index
    %c0_11 = arith.constant 0 : index
    %9 = vector.load %arg4[%c0_10, %c0_11] : memref<8x2xf32, #tpu.memory_space<vmem>>, vector<8x2xf32>
    %c0_12 = arith.constant 0 : index
    %c0_13 = arith.constant 0 : index
    %c0_14 = arith.constant 0 : index
    %10 = vector.load %arg9[%c0_12, %c0_13, %c0_14] : memref<1x2x256xf32, #tpu.memory_space<vmem>>, vector<1x2x256xf32>
    %11 = vector.shape_cast %10 : vector<1x2x256xf32> to vector<2x256xf32>
    %cst_15 = arith.constant dense<0.000000e+00> : vector<8x256xf32>
    %12 = tpu.matmul %9, %11, %cst_15 {dimension_numbers = #tpu.dot_dimension_numbers<[1], [0], [0], [1], [0, 0, 1, 1], [], []>} : vector<8x2xf32>, vector<2x256xf32>, vector<8x256xf32> -> vector<8x256xf32>
    %13 = arith.addf %8, %12 : vector<8x256xf32>
    %c0_16 = arith.constant 0 : index
    %c0_17 = arith.constant 0 : index
    %14 = vector.load %arg5[%c0_16, %c0_17] : memref<8x2xf32, #tpu.memory_space<vmem>>, vector<8x2xf32>
    %c0_18 = arith.constant 0 : index
    %c0_19 = arith.constant 0 : index
    %c0_20 = arith.constant 0 : index
    %15 = vector.load %arg10[%c0_18, %c0_19, %c0_20] : memref<1x2x256xf32, #tpu.memory_space<vmem>>, vector<1x2x256xf32>
    %16 = vector.shape_cast %15 : vector<1x2x256xf32> to vector<2x256xf32>
    %cst_21 = arith.constant dense<0.000000e+00> : vector<8x256xf32>
    %17 = tpu.matmul %14, %16, %cst_21 {dimension_numbers = #tpu.dot_dimension_numbers<[1], [0], [0], [1], [0, 0, 1, 1], [], []>} : vector<8x2xf32>, vector<2x256xf32>, vector<8x256xf32> -> vector<8x256xf32>
    %18 = arith.addf %13, %17 : vector<8x256xf32>
    %c0_22 = arith.constant 0 : index
    %c0_23 = arith.constant 0 : index
    %19 = vector.load %arg6[%c0_22, %c0_23] : memref<8x1xf32, #tpu.memory_space<vmem>>, vector<8x1xf32>
    %20 = vector.broadcast %19 : vector<8x1xf32> to vector<8x256xf32>
    %21 = arith.addf %18, %20 : vector<8x256xf32>
    %cst_24 = arith.constant 0.000000e+00 : f32
    %22 = vector.broadcast %cst_24 : f32 to vector<8x256xf32>
    %23 = arith.subf %22, %21 : vector<8x256xf32>
    %24 = math.exp %23 : vector<8x256xf32>
    %cst_25 = arith.constant 1.000000e+00 : f32
    %25 = vector.broadcast %cst_25 : f32 to vector<8x256xf32>
    %26 = arith.addf %25, %24 : vector<8x256xf32>
    %cst_26 = arith.constant 1.000000e+00 : f32
    %27 = vector.broadcast %cst_26 : f32 to vector<8x256xf32>
    %28 = arith.divf %27, %26 : vector<8x256xf32>
    %29 = arith.mulf %21, %28 : vector<8x256xf32>
    %c0_27 = arith.constant 0 : index
    %c0_28 = arith.constant 0 : index
    %c0_29 = arith.constant 0 : index
    %30 = vector.load %arg11[%c0_27, %c0_28, %c0_29] : memref<1x8x256xf32, #tpu.memory_space<vmem>>, vector<1x8x256xf32>
    %31 = vector.shape_cast %30 : vector<1x8x256xf32> to vector<8x256xf32>
    %32 = vector.shape_cast %29 : vector<8x256xf32> to vector<1x8x256xf32>
    tpu.vector_store %arg11[%c0_27, %c0_28, %c0_29], %32 {strides = array<i32>} : memref<1x8x256xf32, #tpu.memory_space<vmem>>, vector<1x8x256xf32>,
    return
  }
  func.func @transform_0(%arg0: i32, %arg1: i32) -> (i32, i32) {
    %c0_i32 = arith.constant 0 : i32
    %c0_i32_0 = arith.constant 0 : i32
    %c0_i32_1 = arith.constant 0 : i32
    return %c0_i32, %c0_i32_0 : i32, i32
  }
  func.func @transform_1(%arg0: i32, %arg1: i32) -> (i32, i32) {
    %c0_i32 = arith.constant 0 : i32
    %c0_i32_0 = arith.constant 0 : i32
    %c0_i32_1 = arith.constant 0 : i32
    return %c0_i32, %c0_i32_0 : i32, i32
  }
  func.func @transform_2(%arg0: i32, %arg1: i32) -> (i32, i32) {
    %c0_i32 = arith.constant 0 : i32
    %c0_i32_0 = arith.constant 0 : i32
    %c0_i32_1 = arith.constant 0 : i32
    return %c0_i32, %c0_i32_0 : i32, i32
  }
  func.func @transform_3(%arg0: i32, %arg1: i32) -> (i32, i32) {
    %c0_i32 = arith.constant 0 : i32
    %c0_i32_0 = arith.constant 0 : i32
    %c0_i32_1 = arith.constant 0 : i32
    return %c0_i32, %c0_i32_0 : i32, i32
  }
  func.func @transform_4(%arg0: i32, %arg1: i32) -> (i32, i32) {
    %c0_i32 = arith.constant 0 : i32
    %c0_i32_0 = arith.constant 0 : i32
    %c0_i32_1 = arith.constant 0 : i32
    return %c0_i32, %c0_i32_0 : i32, i32
  }
  func.func @transform_5(%arg0: i32, %arg1: i32) -> (i32, i32, i32) {
    %c0_i32 = arith.constant 0 : i32
    %c0_i32_0 = arith.constant 0 : i32
    return %arg0, %c0_i32, %arg1 : i32, i32, i32
  }
  func.func @transform_6(%arg0: i32, %arg1: i32) -> (i32, i32, i32) {
    %c0_i32 = arith.constant 0 : i32
    %c0_i32_0 = arith.constant 0 : i32
    return %arg0, %c0_i32, %arg1 : i32, i32, i32
  }
  func.func @transform_7(%arg0: i32, %arg1: i32) -> (i32, i32, i32) {
    %c0_i32 = arith.constant 0 : i32
    %c0_i32_0 = arith.constant 0 : i32
    return %arg0, %c0_i32, %arg1 : i32, i32, i32
  }
  func.func @transform_8(%arg0: i32, %arg1: i32) -> (i32, i32, i32) {
    %c0_i32 = arith.constant 0 : i32
    %c0_i32_0 = arith.constant 0 : i32
    return %arg0, %c0_i32, %arg1 : i32, i32, i32
  }
  func.func @transform_9(%arg0: i32, %arg1: i32) -> (i32, i32, i32) {
    %c0_i32 = arith.constant 0 : i32
    %c0_i32_0 = arith.constant 0 : i32
    return %arg0, %c0_i32, %arg1 : i32, i32, i32
  }
}

</mosaic_0001>

<bundles_post_ra>
// kernel: sppf.3
= control target key start
LH: loop header
LB: loop body
LE: loop exit
PB: predicated region body
PF: predicated region fallthrough
CT: control target
= control target key end

     0   :  { %s512_s12 = smov 0   ;;  %s514_s13 = smov 0   ;;  %s555_s0 = inlined_call_operand.vmem [shape: f32[2,4], index: 0, kind: input, shape index: {}]   ;;  %s556_s1 = inlined_call_operand.vmem [shape: f32[2,1], index: 1, kind: input, shape index: {}]   ;;  %s557_s2 = inlined_call_operand.vmem [shape: f32[2,4,256], index: 2, kind: input, shape index: {}]   ;;  %s558_s3 = inlined_call_operand.vmem [shape: f32[2,2,256], index: 3, kind: output, shape index: {}]  }
   0x1   :  { %s516_s14 = smov 0  }
   0x2 LB: > { %s25_s15 = sadd.s32 1, %s484_s13  ;;  %p417_p0 = scmp.ge.s32.totalorder %s488_s14, 1  ;;  %s488_s14 = sphi %s516_s14, %s13_s14   ;;  %s484_s13 = sphi %s514_s13, %s560_s13   ;;  %s480_s12 = sphi %s512_s12, %s559_s12  }
   0x3   : > { %p27_p1 = scmp.ge.s32.totalorder %s25_s15, 2  ;;  %p158_p2 = scmp.lt.s32.totalorder %s488_s14, 3 }
   0x5   : > { %s562_s15 = smov (%p27_p1, %s25_s15), 0  ;;  %p159_p3 = pnand %p417_p0, %p158_p2 }
   0x6   : > { %p191_p4 = scmp.lt.s32.totalorder (!%p159_p3), %s480_s12, 1  ;;  %v490_v0 = vmov (!%p159_p3), 0.0   ;;  %v212_v1 = vld [vmem:[%s556_s1] sm:$0x3] (!%p159_p3)  ;;  %v491_v2 = vmov (!%p159_p3), 0   ;;  %vm224_vm0 = vcmask (!%p159_p3), 1043456  }
   0x7   : > { %162 = sbr.rel (%p159_p3) target bundleno = 270 (0x10e), region = 32  ;;  %293 = vmatprep.mubr.f32.mxu0 (!%p159_p3), %v490_v0  ;;  %456 = vset.pattern.permute.xlu0 (!%p159_p3), %v491_v2  ;;  %v210_v5 = vld [vmem:[%s555_s0] sm:$0x3] (!%p159_p3)  ;;  %vm220_vm1 = vcmask (!%p159_p3), 31744  }
   0x8   : > { %215 = vperm.xlu0 (!%p159_p3), %456, %v212_v1  }
   0xe   : > { %s564_s12 = smov (!%p191_p4, %s480_s12), 1 }
   0xf   : > { %s428_s18 = sshll.u32 %s564_s12, 3  ;;  %s429_s24 = sshll.u32 %s564_s12, 2 }
  0x10   : > { %s198_s21 = scalar_lea.vmem %s557_s2, %s428_s18  ;;  %s208_s27 = scalar_lea.vmem %s558_s3, %s429_s24 }
  0x11   : > { %v211_v3 = vld [vmem:[%s198_s21] sm:$0xff] }
  0x12   : > { %v219_v4 = vcombine.high %v211_v3, %v211_v3 }
  0x14   : > { %422 = vmatprep.subr.msk.mxu0 %vm224_vm0, %v219_v4 }
  0x15   : > { %423 = vmatpush1.msk.msra.mxu0 %vm224_vm0, %v211_v3 }
  0x16   : > { %424 = vmatmul.mubr.msk.f32.vlgmr.msra.gmra.mrb[0].mxu0 %vm220_vm1, %v210_v5 }
  0x87   : > { %v216_v6 = vpop.permute.xlu0 %215 }
  0xe9   : > { %v295_v7 = vpop.f32.mrb[0].mxu0 }
  0xea   : > { %v296_v8 = vadd.f32 %v295_v7, %v216_v6  ;;  %v297_v9 = vpop.f32.mrb[1].mxu0 }
  0xeb   : > { %v298_v10 = vadd.f32 %v297_v9, %v216_v6 }
  0xec   : > { %v300_v11 = vsub.f32 0.0, %v296_v8 }
  0xed   : > { %v301_v12 = vsub.f32 0.0, %v298_v10 }
  0xee   : > { %v302_v13 = vmul.f32 1.442695, %v300_v11 }
  0xef   : > { %v304_v14 = vmul.f32 1.442695, %v301_v12 }
  0xf0   : > { %458 = vpow2.f32 %v302_v13 }
  0xf1   : > { %460 = vpow2.f32 %v304_v14 }
  0xfa   : > { %v459_v15 = vpop.eup %458 }
  0xfb   : > { %v461_v16 = vpop.eup %460  ;;  %v306_v17 = vadd.f32 1.0, %v459_v15 }
  0xfc   : > { %v307_v18 = vadd.f32 1.0, %v461_v16 }
  0xfd   : > { %462 = vrcp.f32 %v306_v17 }
  0xfe   : > { %464 = vrcp.f32 %v307_v18 }
 0x107   : > { %v463_v19 = vpop.eup %462 }
 0x108   : > { %v465_v20 = vpop.eup %464  ;;  %v312_v21 = vmul.f32 %v463_v19, %v296_v8 }
 0x109   : > { %v313_v22 = vmul.f32 %v465_v20, %v298_v10 }
 0x10b   : > { %v316_v23 = vcombine.low %v312_v21, %v313_v22 }
 0x10d   : > { %425 = vst.sshfl [vmem:[%s208_s27] sm:$0x33 pattern:$0x76325410] %v316_v23 }
 0x10e PF: > { %s13_s14 = sadd.s32 1, %s488_s14   ;;  %s559_s12 = smov %s484_s13 }
 0x10f   : > { %p10_p5 = scmp.ge.s32.totalorder %s13_s14, 4   ;;  %s560_s13 = smov %s562_s15 }
 0x111   :  { %12 = sbr.rel (!%p10_p5) target bundleno = 2 (0x2), region = 62 }

// kernel: sppf.4
= control target key start
LH: loop header
LB: loop body
LE: loop exit
PB: predicated region body
PF: predicated region fallthrough
CT: control target
= control target key end

     0   :  { %s1159_s12 = smov 0   ;;  %s1161_s13 = smov 0   ;;  %s1392_s0 = inlined_call_operand.vmem [shape: f32[2,2,16,16], index: 0, kind: input, shape index: {}]   ;;  %s1393_s1 = inlined_call_operand.vmem [shape: f32[2,2,16,16], index: 1, kind: output, shape index: {0}]   ;;  %s1394_s2 = inlined_call_operand.vmem [shape: f32[2,2,16,16], index: 2, kind: output, shape index: {1}]   ;;  %s1395_s3 = inlined_call_operand.vmem [shape: f32[2,2,16,16], index: 3, kind: output, shape index: {2}]  }
   0x1   :  { %s1163_s14 = smov 0  }
   0x2 LB: > { %s26_s15 = sadd.s32 1, %s1128_s13  ;;  %p1066_p0 = scmp.ge.s32.totalorder %s1132_s14, 1  ;;  %s1132_s14 = sphi %s1163_s14, %s14_s14   ;;  %s1128_s13 = sphi %s1161_s13, %s1397_s13   ;;  %s1124_s12 = sphi %s1159_s12, %s1396_s12  }
   0x3   : > { %p28_p1 = scmp.ge.s32.totalorder %s26_s15, 2  ;;  %p168_p2 = scmp.lt.s32.totalorder %s1132_s14, 3 }
   0x5   : > { %s1399_s15 = smov (%p28_p1, %s26_s15), 0  ;;  %p169_p3 = pnand %p1066_p0, %p168_p2 }
   0x6   : > { %p223_p4 = scmp.lt.s32.totalorder (!%p169_p3), %s1124_s12, 1  ;;  %s1134_s20 = smov (!%p169_p3), 2   ;;  %vm286_vm0 = vcmask (!%p169_p3), 15360   ;;  %vm291_vm1 = vcmask (!%p169_p3), 146432   ;;  %vm368_vm2 = vcmask (!%p169_p3), 1041408   ;;  %vm389_vm3 = vcmask (!%p169_p3), 1046528  }
   0x7   : > { %172 = sbr.rel (%p169_p3) target bundleno = 854 (0x356), region = 24  ;;  %s1135_s21 = smov (!%p169_p3), 127   ;;  %vm408_vm4 = vcmask (!%p169_p3), 1045504   ;;  %vm427_vm5 = vcmask (!%p169_p3), 1044480   ;;  %vm446_vm6 = vcmask (!%p169_p3), 1043456   ;;  %vm841_vm7 = vcmask (!%p169_p3), 130048  }
   0x8   : > { %s1136_s22 = smov (!%p169_p3), 126   ;;  %s1137_s23 = smov (!%p169_p3), 125  }
   0x9   : > { %s1138_s24 = smov (!%p169_p3), 124  }
   0xe   : > { %s1401_s12 = smov (!%p223_p4, %s1124_s12), 1 }
   0xf   : > { %s1177_s16 = sshll.u32 %s1401_s12, 5 }
  0x10   : > { %s231_s19 = scalar_lea.vmem %s1392_s0, %s1177_s16  ;;  %s1239_s27 = scalar_lea.vmem %s1393_s1, %s1177_s16 }
  0x11   : > { %v266_v0 = vld [vmem:[%s231_s19] sm:$0xff]  ;;  %v268_v1 = vld [vmem:[%s231_s19 + $0x10] sm:$0xff]  ;;  %v267_v2 = vld [vmem:[%s231_s19 + $0x8] sm:$0xff]  ;;  %s253_s30 = scalar_lea.vmem %s1394_s2, %s1177_s16  ;;  %s1362_s6 = scalar_lea.vmem %s1395_s3, %s1177_s16 }
  0x12   : > { %274 = vrot.lane.b32.xlu0 %v266_v0, %s1134_s20  ;;  %278 = vrot.lane.b32.xlu1 %v268_v1, %s1134_s20  ;;  %v269_v3 = vld [vmem:[%s231_s19 + $0x18] sm:$0xff] }
  0x16   : > { %276 = vrot.lane.b32.xlu0 %v267_v2, %s1134_s20  ;;  %280 = vrot.lane.b32.xlu1 %v269_v3, %s1134_s20 }
  0x84   : > { %v275_v4 = vpop.permute.xlu0 %274  ;;  %v279_v5 = vpop.permute.xlu1 %278 }
  0x85   : > { %v287_v6 = vsel %vm286_vm0, -inf, %v275_v4  ;;  %v289_v7 = vsel %vm286_vm0, -inf, %v279_v5 }
  0x86   : > { %v292_v8 = vsel %vm291_vm1, %v287_v6, -inf  ;;  %v294_v9 = vsel %vm291_vm1, %v289_v7, -inf }
  0x87   : > { %300 = vrot.lane.b32.xlu0 %v292_v8, %s1135_s21 }
  0x88   : > { %v277_v10 = vpop.permute.xlu0 %276  ;;  %v281_v11 = vpop.permute.xlu1 %280 }
  0x89   : > { %v288_v12 = vsel %vm286_vm0, -inf, %v277_v10  ;;  %v290_v13 = vsel %vm286_vm0, -inf, %v281_v11 }
  0x8a   : > { %v293_v14 = vsel %vm291_vm1, %v288_v12, -inf  ;;  %v295_v15 = vsel %vm291_vm1, %v290_v13, -inf }
  0x8b   : > { %304 = vrot.lane.b32.xlu0 %v294_v9, %s1135_s21  ;;  %302 = vrot.lane.b32.xlu1 %v293_v14, %s1135_s21 }
  0x8f   : > { %316 = vrot.lane.b32.xlu0 %v292_v8, %s1136_s22  ;;  %306 = vrot.lane.b32.xlu1 %v295_v15, %s1135_s21 }
  0x93   : > { %320 = vrot.lane.b32.xlu0 %v294_v9, %s1136_s22  ;;  %318 = vrot.lane.b32.xlu1 %v293_v14, %s1136_s22 }
  0x97   : > { %332 = vrot.lane.b32.xlu0 %v292_v8, %s1137_s23  ;;  %322 = vrot.lane.b32.xlu1 %v295_v15, %s1136_s22 }
  0x9b   : > { %336 = vrot.lane.b32.xlu0 %v294_v9, %s1137_s23  ;;  %334 = vrot.lane.b32.xlu1 %v293_v14, %s1137_s23 }
  0x9f   : > { %348 = vrot.lane.b32.xlu0 %v292_v8, %s1138_s24  ;;  %338 = vrot.lane.b32.xlu1 %v295_v15, %s1137_s23 }
  0xa3   : > { %352 = vrot.lane.b32.xlu0 %v294_v9, %s1138_s24  ;;  %350 = vrot.lane.b32.xlu1 %v293_v14, %s1138_s24 }
  0xa7   : > { %354 = vrot.lane.b32.xlu1 %v295_v15, %s1138_s24 }
  0xf9   : > { %v301_v16 = vpop.permute.xlu0 %300 }
  0xfa   : > { %v312_v25 = vmax.f32 %v292_v8, %v301_v16 }
  0xfd   : > { %v303_v17 = vpop.permute.xlu1 %302  ;;  %v305_v18 = vpop.permute.xlu0 %304 }
  0xfe   : > { %v313_v29 = vmax.f32 %v293_v14, %v303_v17  ;;  %v314_v30 = vmax.f32 %v294_v9, %v305_v18 }
 0x101   : > { %v307_v19 = vpop.permute.xlu1 %306  ;;  %v317_v20 = vpop.permute.xlu0 %316 }
 0x102   : > { %v328_v28 = vmax.f32 %v312_v25, %v317_v20  ;;  %v315_v37 = vmax.f32 %v295_v15, %v307_v19 }
 0x105   : > { %v319_v21 = vpop.permute.xlu1 %318  ;;  %v321_v22 = vpop.permute.xlu0 %320 }
 0x106   : > { %v329_v34 = vmax.f32 %v313_v29, %v319_v21  ;;  %v330_v35 = vmax.f32 %v314_v30, %v321_v22 }
 0x109   : > { %v323_v23 = vpop.permute.xlu1 %322  ;;  %v333_v24 = vpop.permute.xlu0 %332 }
 0x10a   : > { %v344_v31 = vmax.f32 %v328_v28, %v333_v24  ;;  %v331_v43 = vmax.f32 %v315_v37, %v323_v23 }
 0x10d   : > { %v335_v26 = vpop.permute.xlu1 %334  ;;  %v337_v27 = vpop.permute.xlu0 %336 }
 0x10e   : > { %v345_v38 = vmax.f32 %v329_v34, %v335_v26  ;;  %v346_v39 = vmax.f32 %v330_v35, %v337_v27 }
 0x111   : > { %v339_v32 = vpop.permute.xlu1 %338  ;;  %v349_v33 = vpop.permute.xlu0 %348 }
 0x112   : > { %v360_v36 = vmax.f32 %v344_v31, %v349_v33  ;;  %v347_v46 = vmax.f32 %v331_v43, %v339_v32 }
 0x114   : > { %v369_v40 = vrot.slane %v360_v36, 6 }
 0x115   : > { %v351_v41 = vpop.permute.xlu1 %350  ;;  %v353_v42 = vpop.permute.xlu0 %352 }
 0x116   : > { %v361_v44 = vmax.f32 %v345_v38, %v351_v41  ;;  %v362_v45 = vmax.f32 %v346_v39, %v353_v42  ;;  %v1212_v47 = vsel %vm368_vm2, -inf, %v369_v40 }
 0x117   : > { %v390_v54 = vrot.slane %v1212_v47, 1  ;;  %v409_v58 = vrot.slane %v1212_v47, 2  ;;  %v428_v59 = vrot.slane %v1212_v47, 3  ;;  %v447_v62 = vrot.slane %v1212_v47, 4 }
 0x118   : > { %v370_v48 = vrot.slane %v361_v44, 6  ;;  %v372_v49 = vrot.slane %v362_v45, 6 }
 0x119   : > { %v355_v50 = vpop.permute.xlu1 %354 }
 0x11a   : > { %v371_v51 = vsel %vm368_vm2, %v369_v40, %v370_v48  ;;  %v383_v52 = vsel %vm368_vm2, %v370_v48, -inf  ;;  %v363_v53 = vmax.f32 %v347_v46, %v355_v50  ;;  %v1218_v57 = vsel %vm368_vm2, -inf, %v372_v49 }
 0x11b   : > { %v391_v55 = vrot.slane %v371_v51, 1  ;;  %v393_v56 = vrot.slane %v383_v52, 1  ;;  %v410_v60 = vrot.slane %v371_v51, 2  ;;  %v412_v61 = vrot.slane %v383_v52, 2 }
 0x11c   : > { %v431_v63 = vrot.slane %v383_v52, 3  ;;  %v373_v0 = vrot.slane %v363_v53, 6  ;;  %v450_v2 = vrot.slane %v383_v52, 4  ;;  %v395_v3 = vrot.slane %v1218_v57, 1 }
 0x11d   : > { %v394_v1 = vsel %vm389_vm3, %v391_v55, %v393_v56  ;;  %v429_v5 = vrot.slane %v371_v51, 3  ;;  %v448_v8 = vrot.slane %v371_v51, 4  ;;  %v392_v9 = vsel %vm389_vm3, %v390_v54, %v391_v55 }
 0x11e   : > { %v405_v4 = vmax.f32 %v371_v51, %v394_v1  ;;  %v374_v6 = vsel %vm368_vm2, %v372_v49, %v373_v0  ;;  %v384_v7 = vsel %vm368_vm2, %v373_v0, -inf  ;;  %v414_v10 = vrot.slane %v1218_v57, 2 }
 0x11f   : > { %v396_v11 = vrot.slane %v374_v6, 1  ;;  %v398_v12 = vrot.slane %v384_v7, 1  ;;  %v413_v13 = vsel %vm408_vm4, %v410_v60, %v412_v61  ;;  %v415_v14 = vrot.slane %v374_v6, 2 }
 0x120   : > { %v417_v15 = vrot.slane %v384_v7, 2  ;;  %v424_v16 = vmax.f32 %v405_v4, %v413_v13  ;;  %v411_v17 = vsel %vm408_vm4, %v409_v58, %v410_v60  ;;  %v436_v18 = vrot.slane %v384_v7, 3 }
 0x121   : > { %v455_v19 = vrot.slane %v384_v7, 4  ;;  %v432_v20 = vsel %vm427_vm5, %v429_v5, %v431_v63  ;;  %v404_v21 = vmax.f32 %v1212_v47, %v392_v9  ;;  %v451_v23 = vsel %vm446_vm6, %v448_v8, %v450_v2 }
 0x122   : > { %v443_v22 = vmax.f32 %v424_v16, %v432_v20  ;;  %v399_v24 = vsel %vm389_vm3, %v396_v11, %v398_v12  ;;  %v434_v25 = vrot.slane %v374_v6, 3  ;;  %v430_v27 = vsel %vm427_vm5, %v428_v59, %v429_v5 }
 0x123   : > { %v423_v26 = vmax.f32 %v404_v21, %v411_v17  ;;  %v407_v28 = vmax.f32 %v374_v6, %v399_v24  ;;  %v397_v29 = vsel %vm389_vm3, %v395_v3, %v396_v11  ;;  %v418_v31 = vsel %vm408_vm4, %v415_v14, %v417_v15 }
 0x124   : > { %v462_v30 = vmax.f32 %v443_v22, %v451_v23  ;;  %v453_v32 = vrot.slane %v374_v6, 4  ;;  %v406_v33 = vmax.f32 %v1218_v57, %v397_v29  ;;  %v433_v34 = vrot.slane %v1218_v57, 3 }
 0x125   : > { %v442_v35 = vmax.f32 %v423_v26, %v430_v27  ;;  %v426_v36 = vmax.f32 %v407_v28, %v418_v31  ;;  %v416_v37 = vsel %vm408_vm4, %v414_v10, %v415_v14  ;;  %v449_v38 = vsel %vm446_vm6, %v447_v62, %v448_v8 }
 0x126   : > { %471 = vrot.lane.b32.xlu1 %v462_v30, %s1134_s20  ;;  %843 = vst.msk [vmem:[%s1239_s27 + $0x8] sm:$0xff] %vm841_vm7, %v462_v30  ;;  %v437_v39 = vsel %vm427_vm5, %v434_v25, %v436_v18  ;;  %v425_v40 = vmax.f32 %v406_v33, %v416_v37  ;;  %v452_v41 = vrot.slane %v1218_v57, 4  ;;  %v435_v44 = vsel %vm427_vm5, %v433_v34, %v434_v25 }
 0x127   : > { %v461_v42 = vmax.f32 %v442_v35, %v449_v38  ;;  %v445_v43 = vmax.f32 %v426_v36, %v437_v39  ;;  %v456_v45 = vsel %vm446_vm6, %v453_v32, %v455_v19 }
 0x128   : > { %v444_v46 = vmax.f32 %v425_v40, %v435_v44  ;;  %v454_v48 = vsel %vm446_vm6, %v452_v41, %v453_v32 }
 0x129   : > { %469 = vrot.lane.b32.xlu0 %v461_v42, %s1134_s20  ;;  %842 = vst.msk [vmem:[%s1239_s27] sm:$0xff] %vm841_vm7, %v461_v42  ;;  %v464_v47 = vmax.f32 %v445_v43, %v456_v45 }
 0x12a   : > { %v463_v49 = vmax.f32 %v444_v46, %v454_v48 }
 0x12b   : > { %475 = vrot.lane.b32.xlu1 %v464_v47, %s1134_s20  ;;  %845 = vst.msk [vmem:[%s1239_s27 + $0x18] sm:$0xff] %vm841_vm7, %v464_v47 }
 0x12c   : > { %844 = vst.msk [vmem:[%s1239_s27 + $0x10] sm:$0xff] %vm841_vm7, %v463_v49 }
 0x12d   : > { %473 = vrot.lane.b32.xlu0 %v463_v49, %s1134_s20 }
 0x198   : > { %v472_v50 = vpop.permute.xlu1 %471 }
 0x199   : > { %v482_v51 = vsel %vm286_vm0, -inf, %v472_v50 }
 0x19a   : > { %v486_v52 = vsel %vm291_vm1, %v482_v51, -inf }
 0x19b   : > { %v470_v53 = vpop.permute.xlu0 %469  ;;  %495 = vrot.lane.b32.xlu1 %v486_v52, %s1135_s21 }
 0x19c   : > { %v481_v54 = vsel %vm286_vm0, -inf, %v470_v53 }
 0x19d   : > { %v485_v55 = vsel %vm291_vm1, %v481_v54, -inf  ;;  %v476_v56 = vpop.permute.xlu1 %475 }
 0x19e   : > { %493 = vrot.lane.b32.xlu0 %v485_v55, %s1135_s21  ;;  %v484_v57 = vsel %vm286_vm0, -inf, %v476_v56 }
 0x19f   : > { %v488_v58 = vsel %vm291_vm1, %v484_v57, -inf  ;;  %v474_v59 = vpop.permute.xlu0 %473 }
 0x1a0   : > { %v483_v60 = vsel %vm286_vm0, -inf, %v474_v59  ;;  %499 = vrot.lane.b32.xlu1 %v488_v58, %s1135_s21 }
 0x1a1   : > { %v487_v61 = vsel %vm291_vm1, %v483_v60, -inf }
 0x1a2   : > { %497 = vrot.lane.b32.xlu0 %v487_v61, %s1135_s21 }
 0x1a4   : > { %511 = vrot.lane.b32.xlu1 %v486_v52, %s1136_s22 }
 0x1a6   : > { %509 = vrot.lane.b32.xlu0 %v485_v55, %s1136_s22 }
 0x1a8   : > { %515 = vrot.lane.b32.xlu1 %v488_v58, %s1136_s22 }
 0x1aa   : > { %513 = vrot.lane.b32.xlu0 %v487_v61, %s1136_s22 }
 0x1ac   : > { %527 = vrot.lane.b32.xlu1 %v486_v52, %s1137_s23 }
 0x1ae   : > { %525 = vrot.lane.b32.xlu0 %v485_v55, %s1137_s23 }
 0x1b0   : > { %531 = vrot.lane.b32.xlu1 %v488_v58, %s1137_s23 }
 0x1b2   : > { %529 = vrot.lane.b32.xlu0 %v487_v61, %s1137_s23 }
 0x1b4   : > { %543 = vrot.lane.b32.xlu1 %v486_v52, %s1138_s24 }
 0x1b6   : > { %541 = vrot.lane.b32.xlu0 %v485_v55, %s1138_s24 }
 0x1b8   : > { %547 = vrot.lane.b32.xlu1 %v488_v58, %s1138_s24 }
 0x1ba   : > { %545 = vrot.lane.b32.xlu0 %v487_v61, %s1138_s24 }
 0x20d   : > { %v496_v62 = vpop.permute.xlu1 %495 }
 0x20e   : > { %v506_v8 = vmax.f32 %v486_v52, %v496_v62 }
 0x210   : > { %v494_v63 = vpop.permute.xlu0 %493 }
 0x211   : > { %v505_v10 = vmax.f32 %v485_v55, %v494_v63 }
 0x212   : > { %v500_v0 = vpop.permute.xlu1 %499 }
 0x213   : > { %v508_v13 = vmax.f32 %v488_v58, %v500_v0 }
 0x214   : > { %v498_v1 = vpop.permute.xlu0 %497 }
 0x215   : > { %v507_v17 = vmax.f32 %v487_v61, %v498_v1 }
 0x216   : > { %v512_v2 = vpop.permute.xlu1 %511 }
 0x217   : > { %v522_v11 = vmax.f32 %v506_v8, %v512_v2 }
 0x218   : > { %v510_v3 = vpop.permute.xlu0 %509 }
 0x219   : > { %v521_v14 = vmax.f32 %v505_v10, %v510_v3 }
 0x21a   : > { %v516_v4 = vpop.permute.xlu1 %515 }
 0x21b   : > { %v524_v18 = vmax.f32 %v508_v13, %v516_v4 }
 0x21c   : > { %v514_v5 = vpop.permute.xlu0 %513 }
 0x21d   : > { %v523_v22 = vmax.f32 %v507_v17, %v514_v5 }
 0x21e   : > { %v528_v6 = vpop.permute.xlu1 %527 }
 0x21f   : > { %v538_v15 = vmax.f32 %v522_v11, %v528_v6 }
 0x220   : > { %v526_v7 = vpop.permute.xlu0 %525 }
 0x221   : > { %v537_v19 = vmax.f32 %v521_v14, %v526_v7 }
 0x222   : > { %v532_v9 = vpop.permute.xlu1 %531 }
 0x223   : > { %v540_v23 = vmax.f32 %v524_v18, %v532_v9 }
 0x224   : > { %v530_v12 = vpop.permute.xlu0 %529 }
 0x225   : > { %v539_v27 = vmax.f32 %v523_v22, %v530_v12 }
 0x226   : > { %v544_v16 = vpop.permute.xlu1 %543 }
 0x227   : > { %v554_v20 = vmax.f32 %v538_v15, %v544_v16 }
 0x228   : > { %v542_v21 = vpop.permute.xlu0 %541 }
 0x229   : > { %v562_v24 = vrot.slane %v554_v20, 6  ;;  %v553_v25 = vmax.f32 %v537_v19, %v542_v21 }
 0x22a   : > { %v548_v26 = vpop.permute.xlu1 %547 }
 0x22b   : > { %v575_v28 = vsel %vm368_vm2, %v562_v24, -inf  ;;  %v561_v29 = vrot.slane %v553_v25, 6  ;;  %v556_v30 = vmax.f32 %v540_v23, %v548_v26 }
 0x22c   : > { %v584_v31 = vrot.slane %v575_v28, 1  ;;  %v602_v32 = vrot.slane %v575_v28, 2  ;;  %v546_v33 = vpop.permute.xlu0 %545  ;;  %v620_v38 = vrot.slane %v575_v28, 3  ;;  %v638_v39 = vrot.slane %v575_v28, 4 }
 0x22d   : > { %v563_v34 = vsel %vm368_vm2, %v561_v29, %v562_v24  ;;  %v573_v35 = vsel %vm368_vm2, -inf, %v561_v29  ;;  %v565_v36 = vrot.slane %v556_v30, 6  ;;  %v555_v37 = vmax.f32 %v539_v27, %v546_v33 }
 0x22e   : > { %v581_v40 = vrot.slane %v573_v35, 1  ;;  %v582_v41 = vrot.slane %v563_v34, 1  ;;  %v599_v42 = vrot.slane %v573_v35, 2  ;;  %v600_v43 = vrot.slane %v563_v34, 2 }
 0x22f   : > { %v576_v44 = vsel %vm368_vm2, %v565_v36, -inf  ;;  %v564_v45 = vrot.slane %v555_v37, 6  ;;  %v617_v47 = vrot.slane %v573_v35, 3  ;;  %v635_v48 = vrot.slane %v573_v35, 4 }
 0x230   : > { %v583_v46 = vsel %vm389_vm3, %v581_v40, %v582_v41  ;;  %v589_v49 = vrot.slane %v576_v44, 1  ;;  %v607_v50 = vrot.slane %v576_v44, 2  ;;  %v625_v51 = vrot.slane %v576_v44, 3 }
 0x231   : > { %v566_v52 = vsel %vm368_vm2, %v564_v45, %v565_v36  ;;  %v574_v53 = vsel %vm368_vm2, -inf, %v564_v45  ;;  %v595_v54 = vmax.f32 %v573_v35, %v583_v46  ;;  %v643_v58 = vrot.slane %v576_v44, 4 }
 0x232   : > { %v586_v55 = vrot.slane %v574_v53, 1  ;;  %v587_v56 = vrot.slane %v566_v52, 1  ;;  %v605_v57 = vrot.slane %v566_v52, 2  ;;  %v604_v59 = vrot.slane %v574_v53, 2 }
 0x233   : > { %v622_v60 = vrot.slane %v574_v53, 3  ;;  %v585_v61 = vsel %vm389_vm3, %v582_v41, %v584_v31  ;;  %v603_v0 = vsel %vm408_vm4, %v600_v43, %v602_v32  ;;  %v618_v1 = vrot.slane %v563_v34, 3 }
 0x234   : > { %v588_v62 = vsel %vm389_vm3, %v586_v55, %v587_v56  ;;  %v596_v63 = vmax.f32 %v563_v34, %v585_v61  ;;  %v636_v3 = vrot.slane %v563_v34, 4  ;;  %v601_v4 = vsel %vm408_vm4, %v599_v42, %v600_v43 }
 0x235   : > { %v597_v2 = vmax.f32 %v574_v53, %v588_v62  ;;  %v590_v5 = vsel %vm389_vm3, %v587_v56, %v589_v49  ;;  %v640_v6 = vrot.slane %v574_v53, 4  ;;  %v613_v8 = vmax.f32 %v595_v54, %v601_v4 }
 0x236   : > { %v614_v7 = vmax.f32 %v596_v63, %v603_v0  ;;  %v608_v9 = vsel %vm408_vm4, %v605_v57, %v607_v50  ;;  %v621_v10 = vsel %vm427_vm5, %v618_v1, %v620_v38  ;;  %v619_v11 = vsel %vm427_vm5, %v617_v47, %v618_v1 }
 0x237   : > { %v598_v12 = vmax.f32 %v566_v52, %v590_v5  ;;  %v623_v13 = vrot.slane %v566_v52, 3  ;;  %v631_v15 = vmax.f32 %v613_v8, %v619_v11  ;;  %v641_v16 = vrot.slane %v566_v52, 4 }
 0x238   : > { %v632_v14 = vmax.f32 %v614_v7, %v621_v10  ;;  %v606_v17 = vsel %vm408_vm4, %v604_v59, %v605_v57  ;;  %v639_v18 = vsel %vm446_vm6, %v636_v3, %v638_v39  ;;  %v637_v19 = vsel %vm446_vm6, %v635_v48, %v636_v3 }
 0x239   : > { %v616_v20 = vmax.f32 %v598_v12, %v608_v9  ;;  %v615_v21 = vmax.f32 %v597_v2, %v606_v17  ;;  %v649_v23 = vmax.f32 %v631_v15, %v637_v19  ;;  %v626_v24 = vsel %vm427_vm5, %v623_v13, %v625_v51 }
 0x23a   : > { %v650_v22 = vmax.f32 %v632_v14, %v639_v18  ;;  %v624_v25 = vsel %vm427_vm5, %v622_v60, %v623_v13  ;;  %v644_v28 = vsel %vm446_vm6, %v641_v16, %v643_v58  ;;  %v642_v29 = vsel %vm446_vm6, %v640_v6, %v641_v16 }
 0x23b   : > { %v634_v26 = vmax.f32 %v616_v20, %v626_v24  ;;  %v633_v27 = vmax.f32 %v615_v21, %v624_v25  ;;  %657 = vrot.lane.b32.xlu0 %v649_v23, %s1134_s20  ;;  %846 = vst.msk [vmem:[%s253_s30] sm:$0xff] %vm841_vm7, %v649_v23 }
 0x23c   : > { %659 = vrot.lane.b32.xlu1 %v650_v22, %s1134_s20  ;;  %847 = vst.msk [vmem:[%s253_s30 + $0x8] sm:$0xff] %vm841_vm7, %v650_v22 }
 0x23d   : > { %v652_v30 = vmax.f32 %v634_v26, %v644_v28  ;;  %v651_v31 = vmax.f32 %v633_v27, %v642_v29 }
 0x23f   : > { %849 = vst.msk [vmem:[%s253_s30 + $0x18] sm:$0xff] %vm841_vm7, %v652_v30  ;;  %848 = vst.msk [vmem:[%s253_s30 + $0x10] sm:$0xff] %vm841_vm7, %v651_v31  ;;  %661 = vrot.lane.b32.xlu0 %v651_v31, %s1134_s20 }
 0x240   : > { %663 = vrot.lane.b32.xlu1 %v652_v30, %s1134_s20 }
 0x2ad   : > { %v658_v33 = vpop.permute.xlu0 %657 }
 0x2ae   : > { %v660_v32 = vpop.permute.xlu1 %659  ;;  %v669_v35 = vsel %vm286_vm0, -inf, %v658_v33 }
 0x2af   : > { %v670_v34 = vsel %vm286_vm0, -inf, %v660_v32  ;;  %v673_v37 = vsel %vm291_vm1, %v669_v35, -inf }
 0x2b0   : > { %v674_v36 = vsel %vm291_vm1, %v670_v34, -inf  ;;  %681 = vrot.lane.b32.xlu0 %v673_v37, %s1135_s21 }
 0x2b1   : > { %683 = vrot.lane.b32.xlu1 %v674_v36, %s1135_s21  ;;  %v662_v39 = vpop.permute.xlu0 %661 }
 0x2b2   : > { %v664_v38 = vpop.permute.xlu1 %663  ;;  %v671_v41 = vsel %vm286_vm0, -inf, %v662_v39 }
 0x2b3   : > { %v672_v40 = vsel %vm286_vm0, -inf, %v664_v38  ;;  %v675_v43 = vsel %vm291_vm1, %v671_v41, -inf }
 0x2b4   : > { %v676_v42 = vsel %vm291_vm1, %v672_v40, -inf  ;;  %685 = vrot.lane.b32.xlu0 %v675_v43, %s1135_s21 }
 0x2b5   : > { %687 = vrot.lane.b32.xlu1 %v676_v42, %s1135_s21 }
 0x2b8   : > { %697 = vrot.lane.b32.xlu0 %v673_v37, %s1136_s22 }
 0x2b9   : > { %699 = vrot.lane.b32.xlu1 %v674_v36, %s1136_s22 }
 0x2bc   : > { %701 = vrot.lane.b32.xlu0 %v675_v43, %s1136_s22 }
 0x2bd   : > { %703 = vrot.lane.b32.xlu1 %v676_v42, %s1136_s22 }
 0x2c0   : > { %713 = vrot.lane.b32.xlu0 %v673_v37, %s1137_s23 }
 0x2c1   : > { %715 = vrot.lane.b32.xlu1 %v674_v36, %s1137_s23 }
 0x2c4   : > { %717 = vrot.lane.b32.xlu0 %v675_v43, %s1137_s23 }
 0x2c5   : > { %719 = vrot.lane.b32.xlu1 %v676_v42, %s1137_s23 }
 0x2c8   : > { %729 = vrot.lane.b32.xlu0 %v673_v37, %s1138_s24 }
 0x2c9   : > { %731 = vrot.lane.b32.xlu1 %v674_v36, %s1138_s24 }
 0x2cc   : > { %733 = vrot.lane.b32.xlu0 %v675_v43, %s1138_s24 }
 0x2cd   : > { %735 = vrot.lane.b32.xlu1 %v676_v42, %s1138_s24 }
 0x322   : > { %v682_v45 = vpop.permute.xlu0 %681 }
 0x323   : > { %v684_v44 = vpop.permute.xlu1 %683  ;;  %v693_v55 = vmax.f32 %v673_v37, %v682_v45 }
 0x324   : > { %v694_v54 = vmax.f32 %v674_v36, %v684_v44 }
 0x326   : > { %v686_v47 = vpop.permute.xlu0 %685 }
 0x327   : > { %v688_v46 = vpop.permute.xlu1 %687  ;;  %v695_v6 = vmax.f32 %v675_v43, %v686_v47 }
 0x328   : > { %v696_v62 = vmax.f32 %v676_v42, %v688_v46 }
 0x32a   : > { %v698_v49 = vpop.permute.xlu0 %697 }
 0x32b   : > { %v700_v48 = vpop.permute.xlu1 %699  ;;  %v709_v59 = vmax.f32 %v693_v55, %v698_v49 }
 0x32c   : > { %v710_v58 = vmax.f32 %v694_v54, %v700_v48 }
 0x32e   : > { %v702_v51 = vpop.permute.xlu0 %701 }
 0x32f   : > { %v704_v50 = vpop.permute.xlu1 %703  ;;  %v711_v12 = vmax.f32 %v695_v6, %v702_v51 }
 0x330   : > { %v712_v3 = vmax.f32 %v696_v62, %v704_v50 }
 0x332   : > { %v714_v53 = vpop.permute.xlu0 %713 }
 0x333   : > { %v716_v52 = vpop.permute.xlu1 %715  ;;  %v725_v61 = vmax.f32 %v709_v59, %v714_v53 }
 0x334   : > { %v726_v60 = vmax.f32 %v710_v58, %v716_v52 }
 0x336   : > { %v718_v57 = vpop.permute.xlu0 %717 }
 0x337   : > { %v720_v56 = vpop.permute.xlu1 %719  ;;  %v727_v20 = vmax.f32 %v711_v12, %v718_v57 }
 0x338   : > { %v728_v7 = vmax.f32 %v712_v3, %v720_v56 }
 0x33a   : > { %v730_v0 = vpop.permute.xlu0 %729 }
 0x33b   : > { %v732_v63 = vpop.permute.xlu1 %731  ;;  %v741_v2 = vmax.f32 %v725_v61, %v730_v0 }
 0x33c   : > { %v742_v1 = vmax.f32 %v726_v60, %v732_v63 }
 0x33d   : > { %v749_v5 = vrot.slane %v741_v2, 6 }
 0x33e   : > { %v750_v4 = vrot.slane %v742_v1, 6  ;;  %v734_v23 = vpop.permute.xlu0 %733 }
 0x33f   : > { %v736_v8 = vpop.permute.xlu1 %735  ;;  %v761_v11 = vsel %vm368_vm2, -inf, %v749_v5  ;;  %v743_v35 = vmax.f32 %v727_v20, %v734_v23 }
 0x340   : > { %v763_v9 = vsel %vm368_vm2, %v750_v4, -inf  ;;  %v751_v10 = vsel %vm368_vm2, %v749_v5, %v750_v4  ;;  %v744_v15 = vmax.f32 %v728_v7, %v736_v8  ;;  %v769_v16 = vrot.slane %v761_v11, 1 }
 0x341   : > { %v772_v13 = vrot.slane %v763_v9, 1  ;;  %v790_v14 = vrot.slane %v763_v9, 2  ;;  %v770_v17 = vrot.slane %v751_v10, 1  ;;  %v787_v18 = vrot.slane %v761_v11, 2 }
 0x342   : > { %v788_v19 = vrot.slane %v751_v10, 2  ;;  %v808_v21 = vrot.slane %v763_v9, 3  ;;  %v826_v22 = vrot.slane %v763_v9, 4  ;;  %v805_v26 = vrot.slane %v761_v11, 3 }
 0x343   : > { %v771_v24 = vsel %vm389_vm3, %v769_v16, %v770_v17  ;;  %v773_v25 = vsel %vm389_vm3, %v770_v17, %v772_v13  ;;  %v806_v27 = vrot.slane %v751_v10, 3  ;;  %v823_v30 = vrot.slane %v761_v11, 4 }
 0x344   : > { %v783_v28 = vmax.f32 %v761_v11, %v771_v24  ;;  %v784_v29 = vmax.f32 %v751_v10, %v773_v25  ;;  %v824_v31 = vrot.slane %v751_v10, 4  ;;  %v789_v32 = vsel %vm408_vm4, %v787_v18, %v788_v19 }
 0x345   : > { %v791_v33 = vsel %vm408_vm4, %v788_v19, %v790_v14  ;;  %v753_v34 = vrot.slane %v744_v15, 6  ;;  %v807_v38 = vsel %vm427_vm5, %v805_v26, %v806_v27  ;;  %v809_v39 = vsel %vm427_vm5, %v806_v27, %v808_v21 }
 0x346   : > { %v801_v36 = vmax.f32 %v783_v28, %v789_v32  ;;  %v802_v37 = vmax.f32 %v784_v29, %v791_v33  ;;  %v752_v41 = vrot.slane %v743_v35, 6  ;;  %v825_v44 = vsel %vm446_vm6, %v823_v30, %v824_v31 }
 0x347   : > { %v764_v40 = vsel %vm368_vm2, %v753_v34, -inf  ;;  %v827_v46 = vsel %vm446_vm6, %v824_v31, %v826_v22 }
 0x348   : > { %v819_v42 = vmax.f32 %v801_v36, %v807_v38  ;;  %v820_v43 = vmax.f32 %v802_v37, %v809_v39  ;;  %v777_v45 = vrot.slane %v764_v40, 1  ;;  %v795_v47 = vrot.slane %v764_v40, 2 }
 0x349   : > { %v754_v48 = vsel %vm368_vm2, %v752_v41, %v753_v34  ;;  %v762_v49 = vsel %vm368_vm2, -inf, %v752_v41  ;;  %v813_v54 = vrot.slane %v764_v40, 3  ;;  %v831_v61 = vrot.slane %v764_v40, 4 }
 0x34a   : > { %v837_v50 = vmax.f32 %v819_v42, %v825_v44  ;;  %v838_v51 = vmax.f32 %v820_v43, %v827_v46  ;;  %v774_v52 = vrot.slane %v762_v49, 1  ;;  %v775_v53 = vrot.slane %v754_v48, 1 }
 0x34b   : > { %v792_v55 = vrot.slane %v762_v49, 2  ;;  %v793_v56 = vrot.slane %v754_v48, 2  ;;  %v810_v59 = vrot.slane %v762_v49, 3  ;;  %v811_v60 = vrot.slane %v754_v48, 3 }
 0x34c   : > { %850 = vst.msk [vmem:[%s1362_s6] sm:$0xff] %vm841_vm7, %v837_v50  ;;  %851 = vst.msk [vmem:[%s1362_s6 + $0x8] sm:$0xff] %vm841_vm7, %v838_v51  ;;  %v776_v57 = vsel %vm389_vm3, %v774_v52, %v775_v53  ;;  %v778_v58 = vsel %vm389_vm3, %v775_v53, %v777_v45  ;;  %v828_v2 = vrot.slane %v762_v49, 4  ;;  %v829_v3 = vrot.slane %v754_v48, 4 }
 0x34d   : > { %v785_v62 = vmax.f32 %v762_v49, %v776_v57  ;;  %v786_v63 = vmax.f32 %v754_v48, %v778_v58  ;;  %v794_v0 = vsel %vm408_vm4, %v792_v55, %v793_v56  ;;  %v796_v1 = vsel %vm408_vm4, %v793_v56, %v795_v47 }
 0x34e   : > { %v812_v6 = vsel %vm427_vm5, %v810_v59, %v811_v60  ;;  %v814_v7 = vsel %vm427_vm5, %v811_v60, %v813_v54  ;;  %v830_v10 = vsel %vm446_vm6, %v828_v2, %v829_v3  ;;  %v832_v11 = vsel %vm446_vm6, %v829_v3, %v831_v61 }
 0x34f   : > { %v803_v4 = vmax.f32 %v785_v62, %v794_v0  ;;  %v804_v5 = vmax.f32 %v786_v63, %v796_v1 }
 0x351   : > { %v821_v8 = vmax.f32 %v803_v4, %v812_v6  ;;  %v822_v9 = vmax.f32 %v804_v5, %v814_v7 }
 0x353   : > { %v839_v12 = vmax.f32 %v821_v8, %v830_v10  ;;  %v840_v13 = vmax.f32 %v822_v9, %v832_v11 }
 0x355   : > { %852 = vst.msk [vmem:[%s1362_s6 + $0x10] sm:$0xff] %vm841_vm7, %v839_v12  ;;  %853 = vst.msk [vmem:[%s1362_s6 + $0x18] sm:$0xff] %vm841_vm7, %v840_v13 }
 0x356 PF: > { %s14_s14 = sadd.s32 1, %s1132_s14   ;;  %s1396_s12 = smov %s1128_s13 }
 0x357   : > { %p11_p5 = scmp.ge.s32.totalorder %s14_s14, 4   ;;  %s1397_s13 = smov %s1399_s15 }
 0x359   :  { %13 = sbr.rel (!%p11_p5) target bundleno = 2 (0x2), region = 78 }

// kernel: sppf.5
= control target key start
LH: loop header
LB: loop body
LE: loop exit
PB: predicated region body
PF: predicated region fallthrough
CT: control target
= control target key end

     0   :  { %s1162_s30 = smov 0   ;;  %s1164_s10 = smov 0   ;;  %s1235_s0 = inlined_call_operand.vmem [shape: f32[8,2], index: 0, kind: input, shape index: {}]   ;;  %s1236_s1 = inlined_call_operand.vmem [shape: f32[8,2], index: 1, kind: input, shape index: {}]   ;;  %s1237_s2 = inlined_call_operand.vmem [shape: f32[8,2], index: 2, kind: input, shape index: {}]   ;;  %s1238_s3 = inlined_call_operand.vmem [shape: f32[8,2], index: 3, kind: input, shape index: {}]   ;;  %s1239_s4 = inlined_call_operand.vmem [shape: f32[8,1], index: 4, kind: input, shape index: {}]   ;;  %s1240_s5 = inlined_call_operand.vmem [shape: f32[2,2,256], index: 5, kind: input, shape index: {}]   ;;  %s1241_s6 = inlined_call_operand.vmem [shape: f32[2,2,256], index: 6, kind: input, shape index: {}]   ;;  %s1242_s7 = inlined_call_operand.vmem [shape: f32[2,2,256], index: 7, kind: input, shape index: {}]   ;;  %s1243_s8 = inlined_call_operand.vmem [shape: f32[2,2,256], index: 8, kind: input, shape index: {}]   ;;  %s1244_s9 = inlined_call_operand.vmem [shape: f32[2,8,256], index: 9, kind: output, shape index: {}]  }
   0x1   :  { %s1166_s11 = smov 0  }
   0x2 LB: > { %s31_s12 = sadd.s32 1, %s1104_s10  ;;  %p1011_p0 = scmp.ge.s32.totalorder %s1108_s11, 1  ;;  %s1108_s11 = sphi %s1166_s11, %s19_s11   ;;  %s1104_s10 = sphi %s1164_s10, %s1246_s10   ;;  %s1100_s30 = sphi %s1162_s30, %s1245_s30  }
   0x3   : > { %p33_p1 = scmp.ge.s32.totalorder %s31_s12, 2  ;;  %p359_p2 = scmp.lt.s32.totalorder %s1108_s11, 3 }
   0x5   : > { %s1248_s12 = smov (%p33_p1, %s31_s12), 0  ;;  %p360_p3 = pnand %p1011_p0, %p359_p2 }
   0x6   : > { %p431_p4 = scmp.lt.s32.totalorder (!%p360_p3), %s1100_s30, 1  ;;  %v1110_v0 = vmov (!%p360_p3), 0.0   ;;  %v842_v1 = vld [vmem:[%s1239_s4] sm:$0xff] (!%p360_p3)  ;;  %v1111_v2 = vmov (!%p360_p3), 0   ;;  %vm497_vm0 = vcmask (!%p360_p3), 1041408   ;;  %vm493_vm1 = vcmask (!%p360_p3), 15360  }
   0x7   : > { %363 = sbr.rel (%p360_p3) target bundleno = 279 (0x117), region = 56  ;;  %566 = vmatprep.mubr.f32.mxu1 (!%p360_p3), %v1110_v0  ;;  %742 = vmatprep.mubr.f32.mxu0 (!%p360_p3), %v1110_v0  ;;  %v482_v7 = vld [vmem:[%s1236_s1] sm:$0xff] (!%p360_p3) }
   0x8   : > { %1077 = vset.pattern.permute.xlu0 (!%p360_p3), %v1111_v2  ;;  %v660_v10 = vld [vmem:[%s1237_s2] sm:$0xff] (!%p360_p3) }
   0x9   : > { %845 = vperm.xlu0 (!%p360_p3), %1077, %v842_v1   ;;  %v480_v13 = vld [vmem:[%s1235_s0] sm:$0xff] (!%p360_p3) }
   0xa   : > { %v751_v14 = vld [vmem:[%s1238_s3] sm:$0xff] (!%p360_p3) }
   0xe   : > { %s1250_s30 = smov (!%p431_p4, %s1100_s30), 1 }
   0xf   : > { %s1040_s15 = sshll.u32 %s1250_s30, 2  ;;  %s1044_s19 = sshll.u32 %s1250_s30, 4 }
  0x10   : > { %s448_s18 = scalar_lea.vmem %s1241_s6, %s1040_s15  ;;  %s458_s21 = scalar_lea.vmem %s1242_s7, %s1040_s15 }
  0x11   : > { %v1022_v3 = vld.sshfl [vmem:[%s448_s18] sm:$0x33 pattern:$0x76325410]  ;;  %s438_s24 = scalar_lea.vmem %s1240_s5, %s1040_s15  ;;  %s468_s27 = scalar_lea.vmem %s1243_s8, %s1040_s15 }
  0x12   : > { %v492_v4 = vcombine.high %v1022_v3, %v1022_v3  ;;  %v1030_v5 = vld.sshfl [vmem:[%s458_s21] sm:$0x33 pattern:$0x76325410]  ;;  %s478_s22 = scalar_lea.vmem %s1244_s9, %s1044_s19 }
  0x13   : > { %v670_v6 = vcombine.high %v1030_v5, %v1030_v5  ;;  %v1026_v8 = vld.sshfl [vmem:[%s438_s24] sm:$0x33 pattern:$0x76325410] }
  0x14   : > { %1023 = vmatprep.subr.msk.mxu1 %vm497_vm0, %v492_v4  ;;  %v581_v9 = vcombine.high %v1026_v8, %v1026_v8  ;;  %v1034_v11 = vld.sshfl [vmem:[%s468_s27] sm:$0x33 pattern:$0x76325410] }
  0x15   : > { %1031 = vmatprep.subr.msk.mxu0 %vm497_vm0, %v670_v6  ;;  %1024 = vmatpush1.msk.msra.mxu1 %vm497_vm0, %v1022_v3  ;;  %v761_v12 = vcombine.high %v1034_v11, %v1034_v11 }
  0x16   : > { %1032 = vmatpush1.msk.msra.mxu0 %vm497_vm0, %v1030_v5  ;;  %1025 = vmatmul.mubr.msk.f32.vlgmr.msra.gmra.mrb[0].mxu1 %vm493_vm1, %v482_v7 }
  0x17   : > { %1027 = vmatprep.subr.msk.mxu1 %vm497_vm0, %v581_v9  ;;  %1033 = vmatmul.mubr.msk.f32.vlgmr.msra.gmra.mrb[0].mxu0 %vm493_vm1, %v660_v10 }
  0x18   : > { %1035 = vmatprep.subr.msk.mxu0 %vm497_vm0, %v761_v12  ;;  %1028 = vmatpush1.msk.msra.mxu1 %vm497_vm0, %v1026_v8 }
  0x19   : > { %1036 = vmatpush1.msk.msra.mxu0 %vm497_vm0, %v1034_v11  ;;  %653 = vmatprep.mubr.f32.mxu1 %v1110_v0 }
  0x1a   : > { %833 = vmatprep.mubr.f32.mxu0 %v1110_v0 }
  0x1e   : > { %1029 = vmatmul.mubr.msk.f32.vlgmr.msra.gmra.mrb[0].mxu1 %vm493_vm1, %v480_v13 }
  0x1f   : > { %1037 = vmatmul.mubr.msk.f32.vlgmr.msra.gmra.mrb[0].mxu0 %vm493_vm1, %v751_v14 }
  0x88   : > { %v846_v16 = vpop.permute.xlu0 %845 }
  0xf1   : > { %v655_v15 = vpop.f32.mrb[0].mxu1 }
  0xf2   : > { %v835_v17 = vpop.f32.mrb[0].mxu0  ;;  %v657_v18 = vpop.f32.mrb[1].mxu1 }
  0xf3   : > { %v1045_v19 = vadd.f32 %v835_v17, %v655_v15  ;;  %v837_v20 = vpop.f32.mrb[1].mxu0 }
  0xf4   : > { %v1046_v21 = vadd.f32 %v837_v20, %v657_v18 }
  0xf5   : > { %v848_v22 = vadd.f32 %v1045_v19, %v846_v16 }
  0xf6   : > { %v849_v23 = vadd.f32 %v1046_v21, %v846_v16 }
  0xf7   : > { %v850_v24 = vsub.f32 0.0, %v848_v22 }
  0xf8   : > { %v851_v25 = vsub.f32 0.0, %v849_v23 }
  0xf9   : > { %v852_v26 = vmul.f32 1.442695, %v850_v24 }
  0xfa   : > { %v854_v27 = vmul.f32 1.442695, %v851_v25 }
  0xfb   : > { %1078 = vpow2.f32 %v852_v26 }
  0xfc   : > { %1080 = vpow2.f32 %v854_v27 }
 0x105   : > { %v1079_v28 = vpop.eup %1078 }
 0x106   : > { %v1081_v29 = vpop.eup %1080  ;;  %v856_v30 = vadd.f32 1.0, %v1079_v28 }
 0x107   : > { %v857_v31 = vadd.f32 1.0, %v1081_v29 }
 0x108   : > { %1082 = vrcp.f32 %v856_v30 }
 0x109   : > { %1084 = vrcp.f32 %v857_v31 }
 0x112   : > { %v1083_v32 = vpop.eup %1082 }
 0x113   : > { %v1085_v33 = vpop.eup %1084  ;;  %v862_v34 = vmul.f32 %v1083_v32, %v848_v22 }
 0x114   : > { %v863_v35 = vmul.f32 %v1085_v33, %v849_v23 }
 0x115   : > { %864 = vst [vmem:[%s478_s22] sm:$0xff] %v862_v34 }
 0x116   : > { %865 = vst [vmem:[%s478_s22 + $0x8] sm:$0xff] %v863_v35 }
 0x117 PF: > { %s19_s11 = sadd.s32 1, %s1108_s11   ;;  %s1245_s30 = smov %s1104_s10 }
 0x118   : > { %p16_p5 = scmp.ge.s32.totalorder %s19_s11, 4   ;;  %s1246_s10 = smov %s1248_s12 }
 0x11a   :  { %18 = sbr.rel (!%p16_p5) target bundleno = 2 (0x2), region = 95 }

</bundles_post_ra>
